<compile_context>
chip_gen: v6e
topology: v6e:2x2x1
jax: 0.10.0
libtpu: 0.0.40
codegen_flags: <defaults>
</compile_context>

<pallas_src>
import functools

import jax
import jax.numpy as jnp
from jax.experimental import pallas as pl
from jax.experimental.pallas import tpu as pltpu


def _dice_kernel(p_ref, t_ref, o_ref, acc_pt_ref, acc_s_ref, *, smooth):
    i = pl.program_id(0)

    @pl.when(i == 0)
    def _():
        acc_pt_ref[...] = jnp.zeros_like(acc_pt_ref)  # running pred * target
        acc_s_ref[...] = jnp.zeros_like(acc_s_ref)    # running pred + target

    # In-register upcast (free on the VPU; required on v5e which lacks bf16 ALU).
    p = p_ref[...].astype(jnp.float32)
    t = t_ref[...].astype(jnp.float32)

    # Pure elementwise VPU accumulation: co-issues with the streaming loads,
    # no per-step XLU reduce, no serial SMEM read-modify-write chain.
    acc_pt_ref[...] += p * t
    acc_s_ref[...] += p + t

    @pl.when(i == pl.num_programs(0) - 1)
    def _():
        # Single cross-lane/sublane reduction in the epilogue.
        inter = jnp.sum(acc_pt_ref[...])
        z = jnp.sum(acc_s_ref[...]) + smooth
        o_ref[0] = 1.0 - (2.0 * inter + smooth) / z


def dice_loss(pred, target, smooth=1.0, *, tile_rows=2048):
    """pred, target: [N, 1] (or any shape) in [0, 1]. Returns scalar loss."""
    lanes = 128
    n = pred.size
    p = pred.reshape(-1)
    t = target.reshape(-1)

    # Rows of the lane-dense slab; shrink the tile for small inputs so we do
    # not pad a tiny problem up to a 2048-row block (keep sublane multiple 8).
    rows = pl.cdiv(n, lanes)
    tile_rows = min(tile_rows, max(8, ((rows + 7) // 8) * 8))

    padded_rows = ((rows + tile_rows - 1) // tile_rows) * tile_rows
    padded_n = padded_rows * lanes
    if padded_n != n:
        # Zero padding is exact: padded pred = target = 0 contributes nothing
        # to sum(p*t) or sum(p+t).
        p = jnp.pad(p, (0, padded_n - n))
        t = jnp.pad(t, (0, padded_n - n))

    # Glue only: reshape to a lane-dense (rows, 128) slab in *native* dtype.
    p2 = p.reshape(padded_rows, lanes)
    t2 = t.reshape(padded_rows, lanes)

    grid = (padded_rows // tile_rows,)

    out = pl.pallas_call(
        functools.partial(_dice_kernel, smooth=float(smooth)),
        out_shape=jax.ShapeDtypeStruct((1,), jnp.float32),
        grid_spec=pltpu.PrefetchScalarGridSpec(
            num_scalar_prefetch=0,
            grid=grid,
            in_specs=[
                pl.BlockSpec((tile_rows, lanes), lambda i: (i, 0)),
                pl.BlockSpec((tile_rows, lanes), lambda i: (i, 0)),
            ],
            out_specs=pl.BlockSpec(memory_space=pltpu.MemorySpace.SMEM),
            scratch_shapes=[
                pltpu.VMEM((tile_rows, lanes), jnp.float32),  # acc p*t
                pltpu.VMEM((tile_rows, lanes), jnp.float32),  # acc p+t
            ],
        ),
        compiler_params=pltpu.CompilerParams(
            dimension_semantics=("arbitrary",),
        ),
    )(p2, t2)
    # TODO(synk): on v7x, split the streaming reduction across the two
    # TensorCores (leading 'parallel' grid axis + per-core partials) to use
    # the second core's HBM path.
    return out[0]


def dice_loss_ref(pred, target, smooth=1.0):
    pred = pred.astype(jnp.float32)
    target = target.astype(jnp.float32)
    inter = jnp.sum(pred * target)
    z = pred.sum() + target.sum() + smooth
    return 1.0 - (2.0 * inter + smooth) / z


if __name__ == "__main__":
    key = jax.random.PRNGKey(0)
    k1, k2 = jax.random.split(key)

    # Small shapes consistent with the module's [N, 1] inputs.
    N = 2048
    pred = jax.nn.sigmoid(jax.random.normal(k1, (N, 1), dtype=jnp.float32))
    target = (jax.random.uniform(k2, (N, 1)) > 0.5).astype(jnp.float32)

    loss = jax.block_until_ready(dice_loss(pred, target, smooth=1.0))
    ref = jax.block_until_ready(dice_loss_ref(pred, target, smooth=1.0))
    assert jnp.allclose(loss, ref, rtol=1e-5, atol=1e-6), (loss, ref)

    # Exercise multi-grid-step accumulation explicitly (small tile -> grid > 1).
    loss_multi = jax.block_until_ready(dice_loss(pred, target, smooth=1.0, tile_rows=8))
    assert jnp.allclose(loss_multi, ref, rtol=1e-5, atol=1e-6), (loss_multi, ref)

    # Exercise the zero-padding path (N not a multiple of 128).
    N2 = 1000
    pred2 = jax.nn.sigmoid(jax.random.normal(k1, (N2, 1), dtype=jnp.float32))
    target2 = (jax.random.uniform(k2, (N2, 1)) > 0.5).astype(jnp.float32)
    loss2 = jax.block_until_ready(dice_loss(pred2, target2, smooth=1.0))
    ref2 = jax.block_until_ready(dice_loss_ref(pred2, target2, smooth=1.0))
    assert jnp.allclose(loss2, ref2, rtol=1e-5, atol=1e-6), (loss2, ref2)

    print("KERNEL_OK")
</pallas_src>

<mosaic_0001>
module attributes {stable_mosaic.version = 11 : i64} {
  func.func @_dice_kernel(%arg0: i32, %arg1: memref<16x128xf32, #tpu.memory_space<vmem>>, %arg2: memref<16x128xf32, #tpu.memory_space<vmem>>, %arg3: memref<1xf32, #tpu.memory_space<smem>>, %arg4: memref<16x128xf32, #tpu.memory_space<vmem>>, %arg5: memref<16x128xf32, #tpu.memory_space<vmem>>) attributes {dimension_semantics = [#tpu.dimension_semantics<arbitrary>], iteration_bounds = array<i64: 1>, scalar_prefetch = 0 : i64, scratch_operands = 2 : i64, tpu.core_type = #tpu.core_type<tc>, window_params = [{transform_indices = @transform_0, window_bounds = array<i64: 16, 128>}, {transform_indices = @transform_1, window_bounds = array<i64: 16, 128>}, {transform_indices = @transform_2, window_bounds = array<i64: 1>}]} {
    %c0_i32 = arith.constant 0 : i32
    %0 = arith.cmpi eq, %arg0, %c0_i32 : i32
    %1 = arith.extui %0 : i1 to i32
    %c0_i32_0 = arith.constant 0 : i32
    %2 = arith.cmpi ne, %1, %c0_i32_0 : i32
    scf.if %2 {
      %cst = arith.constant 0.000000e+00 : f32
      %16 = vector.broadcast %cst : f32 to vector<16x128xf32>
      %c0_14 = arith.constant 0 : index
      %c0_15 = arith.constant 0 : index
      %17 = vector.load %arg4[%c0_14, %c0_15] : memref<16x128xf32, #tpu.memory_space<vmem>>, vector<16x128xf32>
      tpu.vector_store %arg4[%c0_14, %c0_15], %16 {strides = array<i32>} : memref<16x128xf32, #tpu.memory_space<vmem>>, vector<16x128xf32>,
      %cst_16 = arith.constant 0.000000e+00 : f32
      %18 = vector.broadcast %cst_16 : f32 to vector<16x128xf32>
      %c0_17 = arith.constant 0 : index
      %c0_18 = arith.constant 0 : index
      %19 = vector.load %arg5[%c0_17, %c0_18] : memref<16x128xf32, #tpu.memory_space<vmem>>, vector<16x128xf32>
      tpu.vector_store %arg5[%c0_17, %c0_18], %18 {strides = array<i32>} : memref<16x128xf32, #tpu.memory_space<vmem>>, vector<16x128xf32>,
    } else {
    }
    %c0 = arith.constant 0 : index
    %c0_1 = arith.constant 0 : index
    %3 = vector.load %arg1[%c0, %c0_1] : memref<16x128xf32, #tpu.memory_space<vmem>>, vector<16x128xf32>
    %c0_2 = arith.constant 0 : index
    %c0_3 = arith.constant 0 : index
    %4 = vector.load %arg2[%c0_2, %c0_3] : memref<16x128xf32, #tpu.memory_space<vmem>>, vector<16x128xf32>
    %c0_4 = arith.constant 0 : index
    %c0_5 = arith.constant 0 : index
    %5 = vector.load %arg4[%c0_4, %c0_5] : memref<16x128xf32, #tpu.memory_space<vmem>>, vector<16x128xf32>
    %6 = arith.mulf %3, %4 : vector<16x128xf32>
    %7 = arith.addf %5, %6 : vector<16x128xf32>
    %c0_6 = arith.constant 0 : index
    %c0_7 = arith.constant 0 : index
    %8 = vector.load %arg4[%c0_6, %c0_7] : memref<16x128xf32, #tpu.memory_space<vmem>>, vector<16x128xf32>
    tpu.vector_store %arg4[%c0_6, %c0_7], %7 {strides = array<i32>} : memref<16x128xf32, #tpu.memory_space<vmem>>, vector<16x128xf32>,
    %c0_8 = arith.constant 0 : index
    %c0_9 = arith.constant 0 : index
    %9 = vector.load %arg5[%c0_8, %c0_9] : memref<16x128xf32, #tpu.memory_space<vmem>>, vector<16x128xf32>
    %10 = arith.addf %3, %4 : vector<16x128xf32>
    %11 = arith.addf %9, %10 : vector<16x128xf32>
    %c0_10 = arith.constant 0 : index
    %c0_11 = arith.constant 0 : index
    %12 = vector.load %arg5[%c0_10, %c0_11] : memref<16x128xf32, #tpu.memory_space<vmem>>, vector<16x128xf32>
    tpu.vector_store %arg5[%c0_10, %c0_11], %11 {strides = array<i32>} : memref<16x128xf32, #tpu.memory_space<vmem>>, vector<16x128xf32>,
    %c0_i32_12 = arith.constant 0 : i32
    %13 = arith.cmpi eq, %arg0, %c0_i32_12 : i32
    %14 = arith.extui %13 : i1 to i32
    %c0_i32_13 = arith.constant 0 : i32
    %15 = arith.cmpi ne, %14, %c0_i32_13 : i32
    scf.if %15 {
      %c0_14 = arith.constant 0 : index
      %c0_15 = arith.constant 0 : index
      %16 = vector.load %arg4[%c0_14, %c0_15] : memref<16x128xf32, #tpu.memory_space<vmem>>, vector<16x128xf32>
      %17 = vector.shape_cast %16 : vector<16x128xf32> to vector<1x16x128xf32>
      %cst = arith.constant dense<0.000000e+00> : vector<1xf32>
      %18 = vector.multi_reduction <add>, %17, %cst [1, 2] : vector<1x16x128xf32> to vector<1xf32>
      %19 = vector.shape_cast %18 : vector<1xf32> to vector<1x1x1xf32>
      %20 = vector.extract %19[0, 0, 0] : f32 from vector<1x1x1xf32>
      %c0_16 = arith.constant 0 : index
      %c0_17 = arith.constant 0 : index
      %21 = vector.load %arg5[%c0_16, %c0_17] : memref<16x128xf32, #tpu.memory_space<vmem>>, vector<16x128xf32>
      %22 = vector.shape_cast %21 : vector<16x128xf32> to vector<1x16x128xf32>
      %cst_18 = arith.constant dense<0.000000e+00> : vector<1xf32>
      %23 = vector.multi_reduction <add>, %22, %cst_18 [1, 2] : vector<1x16x128xf32> to vector<1xf32>
      %24 = vector.shape_cast %23 : vector<1xf32> to vector<1x1x1xf32>
      %25 = vector.extract %24[0, 0, 0] : f32 from vector<1x1x1xf32>
      %cst_19 = arith.constant 1.000000e+00 : f32
      %26 = arith.addf %25, %cst_19 : f32
      %cst_20 = arith.constant 2.000000e+00 : f32
      %27 = arith.mulf %cst_20, %20 : f32
      %cst_21 = arith.constant 1.000000e+00 : f32
      %28 = arith.addf %27, %cst_21 : f32
      %29 = arith.divf %28, %26 : f32
      %cst_22 = arith.constant 1.000000e+00 : f32
      %30 = arith.subf %cst_22, %29 : f32
      %c0_23 = arith.constant 0 : index
      %31 = memref.load %arg3[%c0_23] : memref<1xf32, #tpu.memory_space<smem>>
      memref.store %30, %arg3[%c0_23] : memref<1xf32, #tpu.memory_space<smem>>
    } else {
    }
    return
  }
  func.func @transform_0(%arg0: i32) -> (i32, i32) {
    %c0_i32 = arith.constant 0 : i32
    %c0_i32_0 = arith.constant 0 : i32
    return %arg0, %c0_i32 : i32, i32
  }
  func.func @transform_1(%arg0: i32) -> (i32, i32) {
    %c0_i32 = arith.constant 0 : i32
    %c0_i32_0 = arith.constant 0 : i32
    return %arg0, %c0_i32 : i32, i32
  }
  func.func @transform_2(%arg0: i32) -> i32 {
    %c0_i32 = arith.constant 0 : i32
    %c0_i32_0 = arith.constant 0 : i32
    return %c0_i32 : i32
  }
}

</mosaic_0001>

<bundles_post_ra>
// kernel: tpu_custom_call.1
= control target key start
LH: loop header
LB: loop body
LE: loop exit
PB: predicated region body
PF: predicated region fallthrough
CT: control target
= control target key end

     0   :  { %7 = vsyncpa [#allocation5], 0  ;;  %s216_s0 = inlined_call_operand.hbm [shape: f32[16,128], index: 0, kind: input, shape index: {}]   ;;  %s217_s1 = inlined_call_operand.hbm [shape: f32[16,128], index: 1, kind: input, shape index: {}]   ;;  %s218_s2 = inlined_call_operand.hbm [shape: f32[1], index: 2, kind: output, shape index: {}]  }
   0x1   :  { %8 = vsyncpa [#allocation8], 0 }
   0x2   :  { %9 = vsyncpa [#allocation6], 0  ;;  %s187_s9 = smov [#allocation4]  }
   0x3   :  { %s15_s10 = sshll.u32 %s187_s9, 4  ;;  %s16_s10 = int_to_ptr.vmem [resolvable:$true] %s15_s10 }
   0x4   :  { %s141_s11 = scalar_lea.vmem %s16_s10, 256  ;;  %p146_p1 = scmp.lt.s32.totalorder %s16_s10, %s16_s10 }
   0x5   :  { %p142_p0 = scmp.ne.s32.totalorder %s16_s10, %s141_s11  ;;  %p147_p2 = scmp.lt.s32.totalorder %s141_s11, %s141_s11 }
   0x7   :  { %p148_p3 = por %p147_p2, %p146_p1 }
   0x9   :  { %p149_p4 = pnand %p148_p3, %p142_p0 }
   0xb   :  { %152 = shalt.err (!%p149_p4)
}
   0xc   :  { %s188_s12 = smov 128   ;;  %s189_s13 = smov 8  }
   0xd   :  { %21 = dma.hbm_to_vmem [thread:$0]  %s216_s0, 256, %s16_s10, [#allocation5], %s188_s12, %s188_s12, %s189_s13  }
   0xe   :  { %s190_s16 = smov [#allocation7]  }
   0xf   :  { %s27_s17 = sshll.u32 %s190_s16, 4  ;;  %s28_s17 = int_to_ptr.vmem [resolvable:$true] %s27_s17 }
  0x10   :  { %s161_s18 = scalar_lea.vmem %s28_s17, 256  ;;  %p166_p6 = scmp.lt.s32.totalorder %s28_s17, %s28_s17 }
  0x11   :  { %p162_p5 = scmp.ne.s32.totalorder %s28_s17, %s161_s18  ;;  %p167_p7 = scmp.lt.s32.totalorder %s161_s18, %s161_s18 }
  0x13   :  { %p168_p8 = por %p167_p7, %p166_p6 }
  0x15   :  { %p169_p9 = pnand %p168_p8, %p162_p5 }
  0x17   :  { %172 = shalt.err (!%p169_p9)
}
  0x18   :  { %33 = dma.hbm_to_vmem [thread:$0]  %s217_s1, 256, %s28_s17, [#allocation8], %s188_s12, %s188_s12, %s189_s13  }
  0x19   :  { %181 = dma.done.wait [#allocation5], 256  }
  0x1a   :  { %182 = vsyncadd [#allocation5], 4294967040 }
  0x1b   :  { %183 = dma.done.wait [#allocation8], 256  }
  0x1c   :  { %184 = vsyncadd [#allocation8], 4294967040  ;;  %v48_v0 = vld [vmem:[#allocation4] sm:$0xff]  ;;  %v49_v1 = vld [vmem:[#allocation4 + $0x8] sm:$0xff]  ;;  %s191_s27 = smov [#allocation9]  }
  0x1d   :  { %v50_v2 = vld [vmem:[#allocation7] sm:$0xff]  ;;  %v51_v3 = vld [vmem:[#allocation7 + $0x8] sm:$0xff] }
  0x1e   :  { %v54_v4 = vmul.f32 %v50_v2, %v48_v0  ;;  %v55_v5 = vmul.f32 %v51_v3, %v49_v1  ;;  %v62_v6 = vadd.f32 %v50_v2, %v48_v0  ;;  %v63_v7 = vadd.f32 %v51_v3, %v49_v1 }
  0x20   :  { %v73_v8 = vadd.f32 %v55_v5, %v54_v4  ;;  %v85_v9 = vadd.f32 %v63_v7, %v62_v6 }
  0x22   :  { %74 = vadd.xlane.f32.xlu0 %v73_v8 }
  0x26   :  { %86 = vadd.xlane.f32.xlu0 %v85_v9 }
  0xab   :  { %v75_v10 = vpop.xlane.xlu0 %74 }
  0xac   :  { %v76_v11 = vrot.slane %v75_v10, 4 }
  0xae   :  { %v77_v12 = vadd.f32 %v76_v11, %v75_v10 }
  0xaf   :  { %v87_v13 = vpop.xlane.xlu0 %86 }
  0xb0   :  { %v78_v14 = vrot.slane %v77_v12, 2  ;;  %v88_v15 = vrot.slane %v87_v13, 4 }
  0xb2   :  { %v89_v16 = vadd.f32 %v88_v15, %v87_v13  ;;  %v79_v17 = vadd.f32 %v78_v14, %v77_v12 }
  0xb4   :  { %v90_v18 = vrot.slane %v89_v16, 2  ;;  %v80_v19 = vrot.slane %v79_v17, 1 }
  0xb6   :  { %v91_v20 = vadd.f32 %v90_v18, %v89_v16  ;;  %v81_v21 = vadd.f32 %v80_v19, %v79_v17 }
  0xb8   :  { %120 = vpush %v81_v21  ;;  %v92_v22 = vrot.slane %v91_v20, 1 }
  0xba   :  { %v93_v23 = vadd.f32 %v92_v22, %v91_v20 }
  0xbc   :  { %122 = vpush %v93_v23 }
  0xe9   :  { %s121_s0 = spop %120 }
  0xea   :  { %s96_s22 = smul.f32 2.0, %s121_s0 }
  0xec   :  { %s97_s23 = sadd.f32 1.0, %s96_s22 }
  0xed   :  { %s123_s1 = spop %122 }
  0xee   :  { %s95_s21 = sadd.f32 1.0, %s123_s1 }
  0xf0   :  { %v98_v24 = vstv %s95_s21 }
  0xf1   :  { %131 = vrcp.f32 %v98_v24 }
  0xfe   :  { %v132_v25 = vpop.eup %131 }
  0xff   :  { %124 = vpush %v132_v25 }
 0x130   :  { %s125_s24 = spop %124 }
 0x131   :  { %s101_s25 = smul.f32 %s125_s24, %s97_s23 }
 0x133   :  { %s102_s26 = ssub.f32 1.0, %s101_s25 }
 0x135   :  { %104 = sst [smem:[#allocation9]] %s102_s26 }
 0x136   :  { %112 = dma.smem_to_hbm %s191_s27, 16, %s218_s2, [#allocation6]  }
 0x137   :  { %185 = dma.done.wait [#allocation6], 16  }
 0x138   :  { %186 = vsyncadd [#allocation6], 4294967280 }
 0x139   :  { %116 = sfence }
 0x13a   :  { %117 = vsyncpa [#allocation5], 1 }
 0x13b   :  { %118 = vsyncpa [#allocation8], 1 }
 0x13c   :  { %119 = vsyncpa [#allocation6], 1 }

</bundles_post_ra>
